<compile_context>
chip_gen: v6e
topology: v6e:2x2x1
jax: 0.10.0
libtpu: 0.0.40
codegen_flags: <defaults>
</compile_context>

<pallas_src>
import jax
import jax.numpy as jnp
from jax.experimental import pallas as pl
from jax.experimental.pallas import tpu as pltpu


def _round_up(x: int, m: int) -> int:
    return ((x + m - 1) // m) * m


def _repl_pad_kernel(x_ref, o_ref):
    """Replication pad of BC planes: W left by 1, H top/bottom by 1.

    x_ref: (BC, H, W)          input planes.
    o_ref: (BC, H + 2, W + 1)  padded output planes (exact width).
    """
    x = x_ref[...]                                  # (bc, h, w)

    # Width pad: lane 0 = replicated first column, lanes 1..W = original cols.
    left = x[:, :, :1]                              # (bc, h, 1)
    rows = jnp.concatenate([left, x], axis=2)       # (bc, h, w+1)

    # Height pad: replicate first / last row, single aligned full-block store.
    top = rows[:, :1, :]
    bot = rows[:, -1:, :]
    o_ref[...] = jnp.concatenate([top, rows, bot], axis=1)   # (bc, h+2, w+1)


def replication_pad_1011(x: jax.Array) -> jax.Array:
    """Equivalent of F.pad(x, [1, 0, 1, 1], mode='replicate') for NCHW x."""
    n, c, h, w = x.shape
    ho, wo = h + 2, w + 1
    nc = n * c

    if nc == 0 or h == 0 or w == 0:
        # TODO(synk): zero-size spatial dims are rejected by PyTorch's
        # replication pad; zero-size batch/channel just yields an empty result.
        return jnp.zeros((n, c, ho, wo), dtype=x.dtype)

    x2 = x.reshape(nc, h, w)

    # Planes per grid step: size from the (8,128)-tiled VMEM footprint so the
    # DMA engine, not per-step overhead (~0.35us), dominates.  ~4 MiB per
    # (input + output) tile => ~8 MiB double-buffered, far under any VMEM cap.
    itemsize = jnp.dtype(x.dtype).itemsize

    def _tiled(rows_, cols_):
        return _round_up(max(rows_, 1), 8) * _round_up(max(cols_, 1), 128)

    bytes_per_plane = (_tiled(h, w) + _tiled(ho, wo)) * itemsize
    bc = max(1, min(nc, (4 * 1024 * 1024) // max(bytes_per_plane, 1)))

    out = pl.pallas_call(
        _repl_pad_kernel,
        out_shape=jax.ShapeDtypeStruct((nc, ho, wo), x.dtype),
        grid=(pl.cdiv(nc, bc),),
        in_specs=[pl.BlockSpec((bc, h, w), lambda i: (i, 0, 0))],
        out_specs=pl.BlockSpec((bc, ho, wo), lambda i: (i, 0, 0)),
        compiler_params=pltpu.CompilerParams(
            dimension_semantics=("parallel",),     # shard planes across cores
            vmem_limit_bytes=32 * 1024 * 1024,     # raise v5e's 16 MiB default
        ),
    )(x2)

    return out.reshape(n, c, ho, wo)


if __name__ == "__main__":
    key = jax.random.PRNGKey(0)
    x = jax.random.normal(key, (2, 4, 16, 16), dtype=jnp.float32)

    out = jax.block_until_ready(replication_pad_1011(x))

    # Reference: replication ("edge") pad, H: (1, 1), W: (1, 0).
    ref = jnp.pad(x, ((0, 0), (0, 0), (1, 1), (1, 0)), mode="edge")
    assert out.shape == ref.shape, (out.shape, ref.shape)
    assert jnp.allclose(out, ref), float(jnp.max(jnp.abs(out - ref)))

    # Zero-size variant (the test-case name): empty batch passes through.
    x0 = jnp.zeros((0, 4, 16, 16), dtype=jnp.float32)
    out0 = jax.block_until_ready(replication_pad_1011(x0))
    assert out0.shape == (0, 4, 18, 17)

    print("KERNEL_OK")
</pallas_src>

<mosaic_0001>
module attributes {stable_mosaic.version = 11 : i64} {
  func.func @_repl_pad_kernel(%arg0: i32, %arg1: memref<8x16x16xf32, #tpu.memory_space<vmem>>, %arg2: memref<8x18x17xf32, #tpu.memory_space<vmem>>) attributes {dimension_semantics = [#tpu.dimension_semantics<parallel>], iteration_bounds = array<i64: 1>, scalar_prefetch = 0 : i64, scratch_operands = 0 : i64, tpu.core_type = #tpu.core_type<tc>, window_params = [{transform_indices = @transform_0, window_bounds = array<i64: 8, 16, 16>}, {transform_indices = @transform_1, window_bounds = array<i64: 8, 18, 17>}]} {
    %c0 = arith.constant 0 : index
    %c0_0 = arith.constant 0 : index
    %c0_1 = arith.constant 0 : index
    %0 = vector.load %arg1[%c0, %c0_0, %c0_1] : memref<8x16x16xf32, #tpu.memory_space<vmem>>, vector<8x16x16xf32>
    %1 = vector.extract_strided_slice %0 {offsets = [0, 0, 0], sizes = [8, 16, 1], strides = [1, 1, 1]} : vector<8x16x16xf32> to vector<8x16x1xf32>
    %2 = tpu.concatenate %1, %0 in 2 : vector<8x16x1xf32>, vector<8x16x16xf32> -> vector<8x16x17xf32>
    %3 = vector.extract_strided_slice %2 {offsets = [0, 0, 0], sizes = [8, 1, 17], strides = [1, 1, 1]} : vector<8x16x17xf32> to vector<8x1x17xf32>
    %4 = vector.extract_strided_slice %2 {offsets = [0, 15, 0], sizes = [8, 1, 17], strides = [1, 1, 1]} : vector<8x16x17xf32> to vector<8x1x17xf32>
    %5 = tpu.concatenate %3, %2, %4 in 1 : vector<8x1x17xf32>, vector<8x16x17xf32>, vector<8x1x17xf32> -> vector<8x18x17xf32>
    %c0_2 = arith.constant 0 : index
    %c0_3 = arith.constant 0 : index
    %c0_4 = arith.constant 0 : index
    %6 = vector.load %arg2[%c0_2, %c0_3, %c0_4] : memref<8x18x17xf32, #tpu.memory_space<vmem>>, vector<8x18x17xf32>
    tpu.vector_store %arg2[%c0_2, %c0_3, %c0_4], %5 {strides = array<i32>} : memref<8x18x17xf32, #tpu.memory_space<vmem>>, vector<8x18x17xf32>,
    return
  }
  func.func @transform_0(%arg0: i32) -> (i32, i32, i32) {
    %c0_i32 = arith.constant 0 : i32
    %c0_i32_0 = arith.constant 0 : i32
    %c0_i32_1 = arith.constant 0 : i32
    return %arg0, %c0_i32, %c0_i32_0 : i32, i32, i32
  }
  func.func @transform_1(%arg0: i32) -> (i32, i32, i32) {
    %c0_i32 = arith.constant 0 : i32
    %c0_i32_0 = arith.constant 0 : i32
    %c0_i32_1 = arith.constant 0 : i32
    return %arg0, %c0_i32, %c0_i32_0 : i32, i32, i32
  }
}

</mosaic_0001>

<bundles_post_ra>
// kernel: tpu_custom_call.1
= control target key start
LH: loop header
LB: loop body
LE: loop exit
PB: predicated region body
PF: predicated region fallthrough
CT: control target
= control target key end

     0   :  { %6 = vsyncpa [#allocation3], 0  ;;  %s273_s6 = smov [#allocation2]   ;;  %s466_s0 = inlined_call_operand.hbm [shape: f32[8,16,16], index: 0, kind: input, shape index: {}]   ;;  %s467_s1 = inlined_call_operand.vmem [shape: f32[8,18,17], index: 1, kind: output, shape index: {}]  }
   0x1   :  { %s12_s7 = sshll.u32 %s273_s6, 4  ;;  %s13_s7 = int_to_ptr.vmem [resolvable:$true] %s12_s7 }
   0x2   :  { %s259_s8 = scalar_lea.vmem %s13_s7, 2048  ;;  %p264_p1 = scmp.lt.s32.totalorder %s13_s7, %s13_s7 }
   0x3   :  { %p260_p0 = scmp.ne.s32.totalorder %s13_s7, %s259_s8  ;;  %p265_p2 = scmp.lt.s32.totalorder %s259_s8, %s259_s8 }
   0x5   :  { %p266_p3 = por %p265_p2, %p264_p1 }
   0x7   :  { %p267_p4 = pnand %p266_p3, %p260_p0 }
   0x9   :  { %270 = shalt.err (!%p267_p4)
}
   0xa   :  { %s274_s9 = smov 128   ;;  %s275_s10 = smov 8  }
   0xb   :  { %18 = dma.hbm_to_vmem [thread:$0]  %s466_s0, 2048, %s13_s7, [#allocation3], %s274_s9, %s274_s9, %s275_s10  }
   0xc   :  { %271 = dma.done.wait [#allocation3], 2048  }
   0xd   :  { %272 = vsyncadd [#allocation3], 4294965248  ;;  %v24_v0 = vld [vmem:[#allocation2 + $0x10] sm:$0xff]  ;;  %v22_v1 = vld [vmem:[#allocation2] sm:$0xff]  ;;  %s276_s13 = smov 1   ;;  %vm102_vm0 = vcmask 7168  }
   0xe   :  { %58 = vrot.lane.b32.xlu1 %v24_v0, %s276_s13  ;;  %54 = vrot.lane.b32.xlu0 %v22_v1, %s276_s13  ;;  %v25_v2 = vld [vmem:[#allocation2 + $0x18] sm:$0xff]  ;;  %v23_v3 = vld [vmem:[#allocation2 + $0x8] sm:$0xff]  ;;  %v26_v5 = vld [vmem:[#allocation2 + $0x20] sm:$0xff]  ;;  %vm135_vm1 = vcmask 1040384   ;;  %vm216_vm2 = vcmask 138240   ;;  %vm219_vm3 = vcmask 132096  }
   0xf   :  { %v27_v4 = vld [vmem:[#allocation2 + $0x28] sm:$0xff]  ;;  %v290_v6 = vld [vmem:[#allocation2 + $0x38] sm:$0xff]  ;;  %v292_v7 = vld [vmem:[#allocation2 + $0x30] sm:$0xff] }
  0x10   :  { %v296_v8 = vld [vmem:[#allocation2 + $0x48] sm:$0xff]  ;;  %v298_v9 = vld [vmem:[#allocation2 + $0x40] sm:$0xff]  ;;  %v302_v10 = vld [vmem:[#allocation2 + $0x58] sm:$0xff] }
  0x11   :  { %v304_v11 = vld [vmem:[#allocation2 + $0x50] sm:$0xff]  ;;  %v308_v12 = vld [vmem:[#allocation2 + $0x68] sm:$0xff]  ;;  %v310_v13 = vld [vmem:[#allocation2 + $0x60] sm:$0xff] }
  0x12   :  { %60 = vrot.lane.b32.xlu1 %v25_v2, %s276_s13  ;;  %56 = vrot.lane.b32.xlu0 %v23_v3, %s276_s13  ;;  %v314_v14 = vld [vmem:[#allocation2 + $0x78] sm:$0xff]  ;;  %v316_v15 = vld [vmem:[#allocation2 + $0x70] sm:$0xff] }
  0x16   :  { %64 = vrot.lane.b32.xlu1 %v27_v4, %s276_s13  ;;  %62 = vrot.lane.b32.xlu0 %v26_v5, %s276_s13 }
  0x1a   :  { %68 = vrot.lane.b32.xlu1 %v290_v6, %s276_s13  ;;  %66 = vrot.lane.b32.xlu0 %v292_v7, %s276_s13 }
  0x1e   :  { %72 = vrot.lane.b32.xlu1 %v296_v8, %s276_s13  ;;  %70 = vrot.lane.b32.xlu0 %v298_v9, %s276_s13 }
  0x22   :  { %76 = vrot.lane.b32.xlu1 %v302_v10, %s276_s13  ;;  %74 = vrot.lane.b32.xlu0 %v304_v11, %s276_s13 }
  0x26   :  { %80 = vrot.lane.b32.xlu1 %v308_v12, %s276_s13  ;;  %78 = vrot.lane.b32.xlu0 %v310_v13, %s276_s13 }
  0x2a   :  { %84 = vrot.lane.b32.xlu1 %v314_v14, %s276_s13  ;;  %82 = vrot.lane.b32.xlu0 %v316_v15, %s276_s13 }
  0x80   :  { %v59_v16 = vpop.permute.xlu1 %58  ;;  %v55_v17 = vpop.permute.xlu0 %54 }
  0x81   :  { %v105_v18 = vsel %vm102_vm0, %v24_v0, %v59_v16  ;;  %v103_v19 = vsel %vm102_vm0, %v22_v1, %v55_v17 }
  0x82   :  { %v139_v20 = vrot.slane %v105_v18, 7  ;;  %v136_v21 = vrot.slane %v103_v19, 7 }
  0x84   :  { %v201_v22 = vsel %vm135_vm1, %v105_v18, %v139_v20  ;;  %v200_v23 = vsel %vm135_vm1, %v103_v19, %v136_v21  ;;  %v61_v24 = vpop.permute.xlu1 %60  ;;  %v57_v25 = vpop.permute.xlu0 %56 }
  0x85   :  { %221 = vst.msk [vmem:[%s467_s1 + $0x18] sm:$0xff] %vm216_vm2, %v201_v22  ;;  %217 = vst.msk [vmem:[%s467_s1] sm:$0xff] %vm216_vm2, %v200_v23  ;;  %v106_v26 = vsel %vm102_vm0, %v25_v2, %v61_v24  ;;  %v104_v27 = vsel %vm102_vm0, %v23_v3, %v57_v25 }
  0x86   :  { %v140_v28 = vrot.slane %v106_v26, 7  ;;  %v185_v29 = vrot.slane %v106_v26, 6  ;;  %v137_v30 = vrot.slane %v104_v27, 7  ;;  %v184_v31 = vrot.slane %v104_v27, 6 }
  0x88   :  { %v141_v32 = vsel %vm135_vm1, %v139_v20, %v140_v28  ;;  %v209_v33 = vsel %vm135_vm1, %v140_v28, %v185_v29  ;;  %v138_v34 = vsel %vm135_vm1, %v136_v21, %v137_v30  ;;  %v208_v35 = vsel %vm135_vm1, %v137_v30, %v184_v31  ;;  %v65_v36 = vpop.permute.xlu1 %64  ;;  %v63_v37 = vpop.permute.xlu0 %62 }
  0x89   :  { %222 = vst.msk [vmem:[%s467_s1 + $0x20] sm:$0xff] %vm216_vm2, %v141_v32  ;;  %218 = vst.msk [vmem:[%s467_s1 + $0x8] sm:$0xff] %vm216_vm2, %v138_v34  ;;  %v108_v38 = vsel %vm102_vm0, %v27_v4, %v65_v36  ;;  %v107_v39 = vsel %vm102_vm0, %v26_v5, %v63_v37 }
  0x8a   :  { %223 = vst.msk [vmem:[%s467_s1 + $0x28] sm:$0x3] %vm219_vm3, %v209_v33  ;;  %220 = vst.msk [vmem:[%s467_s1 + $0x10] sm:$0x3] %vm219_vm3, %v208_v35  ;;  %v143_v40 = vrot.slane %v108_v38, 7  ;;  %v186_v41 = vrot.slane %v108_v38, 6 }
  0x8b   :  { %v142_v42 = vrot.slane %v107_v39, 7 }
  0x8c   :  { %v210_v43 = vsel %vm135_vm1, %v143_v40, %v186_v41  ;;  %v69_v46 = vpop.permute.xlu1 %68  ;;  %v67_v47 = vpop.permute.xlu0 %66 }
  0x8d   :  { %v144_v44 = vsel %vm135_vm1, %v142_v42, %v143_v40  ;;  %v202_v45 = vsel %vm135_vm1, %v107_v39, %v142_v42  ;;  %226 = vst.msk [vmem:[%s467_s1 + $0x40] sm:$0x3] %vm219_vm3, %v210_v43  ;;  %v110_v48 = vsel %vm102_vm0, %v290_v6, %v69_v46  ;;  %v109_v49 = vsel %vm102_vm0, %v292_v7, %v67_v47 }
  0x8e   :  { %224 = vst.msk [vmem:[%s467_s1 + $0x30] sm:$0xff] %vm216_vm2, %v202_v45  ;;  %225 = vst.msk [vmem:[%s467_s1 + $0x38] sm:$0xff] %vm216_vm2, %v144_v44  ;;  %v146_v50 = vrot.slane %v110_v48, 7  ;;  %v187_v51 = vrot.slane %v110_v48, 6  ;;  %v145_v52 = vrot.slane %v109_v49, 7 }
  0x90   :  { %v211_v53 = vsel %vm135_vm1, %v146_v50, %v187_v51  ;;  %v147_v54 = vsel %vm135_vm1, %v145_v52, %v146_v50  ;;  %v203_v55 = vsel %vm135_vm1, %v109_v49, %v145_v52  ;;  %v73_v56 = vpop.permute.xlu1 %72  ;;  %v71_v57 = vpop.permute.xlu0 %70 }
  0x91   :  { %229 = vst.msk [vmem:[%s467_s1 + $0x58] sm:$0x3] %vm219_vm3, %v211_v53  ;;  %v112_v58 = vsel %vm102_vm0, %v296_v8, %v73_v56  ;;  %v111_v59 = vsel %vm102_vm0, %v298_v9, %v71_v57 }
  0x92   :  { %227 = vst.msk [vmem:[%s467_s1 + $0x48] sm:$0xff] %vm216_vm2, %v203_v55  ;;  %228 = vst.msk [vmem:[%s467_s1 + $0x50] sm:$0xff] %vm216_vm2, %v147_v54  ;;  %v149_v60 = vrot.slane %v112_v58, 7  ;;  %v188_v61 = vrot.slane %v112_v58, 6  ;;  %v148_v62 = vrot.slane %v111_v59, 7 }
  0x94   :  { %v212_v63 = vsel %vm135_vm1, %v149_v60, %v188_v61  ;;  %v150_v0 = vsel %vm135_vm1, %v148_v62, %v149_v60  ;;  %v204_v1 = vsel %vm135_vm1, %v111_v59, %v148_v62  ;;  %v77_v2 = vpop.permute.xlu1 %76  ;;  %v75_v3 = vpop.permute.xlu0 %74 }
  0x95   :  { %232 = vst.msk [vmem:[%s467_s1 + $0x70] sm:$0x3] %vm219_vm3, %v212_v63  ;;  %v114_v4 = vsel %vm102_vm0, %v302_v10, %v77_v2  ;;  %v113_v5 = vsel %vm102_vm0, %v304_v11, %v75_v3 }
  0x96   :  { %230 = vst.msk [vmem:[%s467_s1 + $0x60] sm:$0xff] %vm216_vm2, %v204_v1  ;;  %231 = vst.msk [vmem:[%s467_s1 + $0x68] sm:$0xff] %vm216_vm2, %v150_v0  ;;  %v152_v6 = vrot.slane %v114_v4, 7  ;;  %v189_v7 = vrot.slane %v114_v4, 6  ;;  %v151_v8 = vrot.slane %v113_v5, 7 }
  0x98   :  { %v213_v9 = vsel %vm135_vm1, %v152_v6, %v189_v7  ;;  %v153_v16 = vsel %vm135_vm1, %v151_v8, %v152_v6  ;;  %v205_v17 = vsel %vm135_vm1, %v113_v5, %v151_v8  ;;  %v81_v18 = vpop.permute.xlu1 %80  ;;  %v79_v19 = vpop.permute.xlu0 %78 }
  0x99   :  { %235 = vst.msk [vmem:[%s467_s1 + $0x88] sm:$0x3] %vm219_vm3, %v213_v9  ;;  %v116_v10 = vsel %vm102_vm0, %v308_v12, %v81_v18  ;;  %v115_v11 = vsel %vm102_vm0, %v310_v13, %v79_v19 }
  0x9a   :  { %233 = vst.msk [vmem:[%s467_s1 + $0x78] sm:$0xff] %vm216_vm2, %v205_v17  ;;  %234 = vst.msk [vmem:[%s467_s1 + $0x80] sm:$0xff] %vm216_vm2, %v153_v16  ;;  %v155_v20 = vrot.slane %v116_v10, 7  ;;  %v190_v21 = vrot.slane %v116_v10, 6  ;;  %v154_v22 = vrot.slane %v115_v11, 7 }
  0x9c   :  { %v214_v23 = vsel %vm135_vm1, %v155_v20, %v190_v21  ;;  %v156_v24 = vsel %vm135_vm1, %v154_v22, %v155_v20  ;;  %v206_v25 = vsel %vm135_vm1, %v115_v11, %v154_v22  ;;  %v85_v26 = vpop.permute.xlu1 %84  ;;  %v83_v27 = vpop.permute.xlu0 %82 }
  0x9d   :  { %238 = vst.msk [vmem:[%s467_s1 + $0xa0] sm:$0x3] %vm219_vm3, %v214_v23  ;;  %v118_v12 = vsel %vm102_vm0, %v314_v14, %v85_v26  ;;  %v117_v13 = vsel %vm102_vm0, %v316_v15, %v83_v27 }
  0x9e   :  { %236 = vst.msk [vmem:[%s467_s1 + $0x90] sm:$0xff] %vm216_vm2, %v206_v25  ;;  %237 = vst.msk [vmem:[%s467_s1 + $0x98] sm:$0xff] %vm216_vm2, %v156_v24  ;;  %v158_v28 = vrot.slane %v118_v12, 7  ;;  %v191_v29 = vrot.slane %v118_v12, 6  ;;  %v157_v30 = vrot.slane %v117_v13, 7 }
  0xa0   :  { %v215_v31 = vsel %vm135_vm1, %v158_v28, %v191_v29  ;;  %v159_v32 = vsel %vm135_vm1, %v157_v30, %v158_v28  ;;  %v207_v33 = vsel %vm135_vm1, %v117_v13, %v157_v30 }
  0xa1   :  { %241 = vst.msk [vmem:[%s467_s1 + $0xb8] sm:$0x3] %vm219_vm3, %v215_v31 }
  0xa2   :  { %239 = vst.msk [vmem:[%s467_s1 + $0xa8] sm:$0xff] %vm216_vm2, %v207_v33  ;;  %240 = vst.msk [vmem:[%s467_s1 + $0xb0] sm:$0xff] %vm216_vm2, %v159_v32 }
  0xa3   :  { %246 = vsyncpa [#allocation3], 1 }

</bundles_post_ra>
